<compile_context>
chip_gen: v7x
topology: tpu7x:2x2x1
jax: 0.10.0
libtpu: 0.0.40
codegen_flags: <defaults>
</compile_context>

<pallas_src>
import math

import jax
import jax.numpy as jnp
import numpy as np
from jax import lax
from jax.experimental import pallas as pl
from jax.experimental.pallas import tpu as pltpu


# ----------------------------------------------------------------------------
# Kernel 1: GraphNet projection (soft assign + node aggregation + normalize),
# tiled over N with VMEM accumulators.
# ----------------------------------------------------------------------------
def _project_kernel(x_ref, anchor_ref, inv_s_ref, nodes_ref, assign_ref,
                    sxs_acc, denom_acc):
    # x_ref:      (1, C, TN)  current batch element, current N tile
    # anchor_ref: (K, C)
    # inv_s_ref:  (K, C)      1 / (sigmoid(sigma) + 1e-7)
    # nodes_ref:  (1, K, C)   output, written on the last N tile only
    # assign_ref: (1, K, TN)  output soft assignment for this tile
    # sxs_acc:    (K, C)      VMEM scratch: running  soft @ x^T
    # denom_acc:  (K, 1)      VMEM scratch: running  sum_n soft
    n = pl.program_id(1)

    @pl.when(n == 0)
    def _init():
        sxs_acc[...] = jnp.zeros_like(sxs_acc)
        denom_acc[...] = jnp.zeros_like(denom_acc)

    x = x_ref[0]                                   # (C, TN)
    anchor = anchor_ref[...]                       # (K, C)
    inv_s = inv_s_ref[...]                         # (K, C)
    inv_s2 = inv_s * inv_s                         # (K, C)
    a_is2 = anchor * inv_s2                        # (K, C)
    const_k = jnp.sum(anchor * a_is2, axis=1, keepdims=True)   # (K, 1)

    # logits[k, n] = -0.5 * sum_c ((x[c,n]-a[k,c]) * inv_s[k,c])^2
    #             = -0.5 * (inv_s2 @ x^2 - 2 * a_is2 @ x + const_k)   (MXU)
    q = jnp.dot(inv_s2, x * x, preferred_element_type=jnp.float32)   # (K, TN)
    r = jnp.dot(a_is2, x, preferred_element_type=jnp.float32)        # (K, TN)
    logits = -0.5 * (q - 2.0 * r + const_k)                          # (K, TN)

    # softmax over the node axis (torch dim=1)
    m = jnp.max(logits, axis=0, keepdims=True)
    e = jnp.exp(logits - m)
    soft = e / jnp.sum(e, axis=0, keepdims=True)                     # (K, TN)
    assign_ref[0] = soft

    # running sums for the node aggregation:
    #   numer = inv_s * (soft @ x^T - anchor * denom)
    sxs_acc[...] += lax.dot_general(soft, x, (((1,), (1,)), ((), ())),
                                    preferred_element_type=jnp.float32)  # (K, C)
    denom_acc[...] += jnp.sum(soft, axis=1, keepdims=True)               # (K, 1)

    @pl.when(n == pl.num_programs(1) - 1)
    def _finalize():
        denom = denom_acc[...]                                           # (K, 1)
        numer = inv_s * (sxs_acc[...] - anchor * denom)                  # (K, C)
        nodes = numer / (denom + 1e-7)

        # F.normalize(nodes, p=2, dim=2): per-node L2 over channels
        row_norm = jnp.sqrt(jnp.sum(nodes * nodes, axis=1, keepdims=True))
        nodes = nodes / jnp.maximum(row_norm, 1e-12)
        # F.normalize(nodes.view(B, -1), p=2, dim=1): global L2 over (K*C)
        glob_norm = jnp.sqrt(jnp.sum(nodes * nodes))
        nodes_ref[0] = nodes / jnp.maximum(glob_norm, 1e-12)


# ----------------------------------------------------------------------------
# Kernel 2: graph.bmm(assign) -> out tile, tiled over N (lane-dense stores)
# ----------------------------------------------------------------------------
def _bmm_kernel(gt_ref, assign_ref, out_ref):
    # gt_ref:     (1, K, C)   relu(GCN(graph))^T  (graph is (C, K) in torch)
    # assign_ref: (1, K, TN)
    # out_ref:    (1, C, TN)
    out_ref[0] = lax.dot_general(gt_ref[0], assign_ref[0],
                                 (((0,), (0,)), ((), ())),
                                 preferred_element_type=jnp.float32)


def _pick_tile_n(n):
    for t in (2048, 1024, 512, 256, 128):
        if n % t == 0:
            return t
    return n  # fall back to the full (un-tiled) extent


# ----------------------------------------------------------------------------
# Wrapper
# ----------------------------------------------------------------------------
def gcu_forward(x, anchor, sigma_param, gcn_weights, *, tn=None):
    """x: (B, C, H, W) float32.  Returns (B, C, H, W)."""
    B, C, H, W = x.shape
    N = H * W
    K = anchor.shape[0]
    loop = gcn_weights.shape[0]

    if tn is None:
        tn = _pick_tile_n(N)
    assert N % tn == 0, "spatial size must be divisible by the N tile"
    nt = N // tn

    x_flat = x.reshape(B, C, N)
    sigma = jax.nn.sigmoid(sigma_param)            # (K, C)
    inv_s = 1.0 / (sigma + 1e-7)                   # (K, C)

    # ---- kernel 1: projection (soft assign + nodes) ---------------------------
    cost1 = pl.CostEstimate(
        flops=int(B * (6 * K * C * N + 12 * K * N)),
        transcendentals=int(B * K * N),
        bytes_accessed=int(4 * (B * C * N + B * K * N + B * K * C + 2 * K * C)),
    )
    nodes, assign = pl.pallas_call(
        _project_kernel,
        out_shape=(
            jax.ShapeDtypeStruct((B, K, C), jnp.float32),
            jax.ShapeDtypeStruct((B, K, N), jnp.float32),
        ),
        grid=(B, nt),
        in_specs=[
            pl.BlockSpec((1, C, tn), lambda b, n: (b, 0, n)),
            pl.BlockSpec((K, C), lambda b, n: (0, 0)),
            pl.BlockSpec((K, C), lambda b, n: (0, 0)),
        ],
        out_specs=(
            pl.BlockSpec((1, K, C), lambda b, n: (b, 0, 0)),
            pl.BlockSpec((1, K, tn), lambda b, n: (b, 0, n)),
        ),
        scratch_shapes=[
            pltpu.VMEM((K, C), jnp.float32),   # soft @ x^T accumulator
            pltpu.VMEM((K, 1), jnp.float32),   # denom accumulator
        ],
        compiler_params=pltpu.CompilerParams(
            dimension_semantics=("parallel", "arbitrary"),
            vmem_limit_bytes=32 * 1024 * 1024),
        cost_estimate=cost1,
    )(x_flat, anchor, inv_s)

    # ---- cascade GCN on the tiny (C, K) graph: plain XLA ----------------------
    # torch: nodes.view(B, -1).view(B, C, node_num)  (raw reinterpretation)
    hp = jax.lax.Precision.HIGHEST
    graph = nodes.reshape(B, K * C).reshape(B, C, K)
    gt = jnp.transpose(graph, (0, 2, 1))                                  # (B, K, C)
    for l in range(loop):
        adj = jax.nn.softmax(
            jnp.einsum("bic,bjc->bij", gt, gt, precision=hp), axis=2)     # (B, K, K)
        support = jnp.einsum("bkc,cd->bkd", gt, gcn_weights[l], precision=hp)
        gt = jnp.einsum("bij,bjc->bic", adj, support, precision=hp)       # (B, K, C)
    gt = jnp.maximum(gt, 0.0)                                             # ReLU

    # ---- kernel 2: graph.bmm(assign), tiled over N ----------------------------
    cost2 = pl.CostEstimate(
        flops=int(B * 2 * K * C * N),
        transcendentals=0,
        bytes_accessed=int(4 * B * (K * N + C * N + K * C)),
    )
    out_flat = pl.pallas_call(
        _bmm_kernel,
        out_shape=jax.ShapeDtypeStruct((B, C, N), jnp.float32),
        grid=(B, nt),
        in_specs=[
            pl.BlockSpec((1, K, C), lambda b, n: (b, 0, 0)),
            pl.BlockSpec((1, K, tn), lambda b, n: (b, 0, n)),
        ],
        out_specs=pl.BlockSpec((1, C, tn), lambda b, n: (b, 0, n)),
        compiler_params=pltpu.CompilerParams(
            dimension_semantics=("parallel", "parallel"),
            vmem_limit_bytes=32 * 1024 * 1024),
        cost_estimate=cost2,
    )(gt, assign)

    return out_flat.reshape(B, C, H, W)


# ----------------------------------------------------------------------------
# Pure-JAX reference (mirrors the PyTorch forward exactly) for a sanity check
# ----------------------------------------------------------------------------
def gcu_reference(x, anchor, sigma_param, gcn_weights):
    hp = jax.lax.Precision.HIGHEST
    B, C, H, W = x.shape
    N = H * W
    K = anchor.shape[0]
    sigma = jax.nn.sigmoid(sigma_param)
    xt = jnp.transpose(x.reshape(B, C, N), (0, 2, 1))                     # (B, N, C)
    residual = (xt[:, None, :, :] - anchor[None, :, None, :]) / (
        sigma[None, :, None, :] + 1e-7)                                   # (B, K, N, C)
    logits = -0.5 * jnp.sum(residual ** 2, axis=3)                        # (B, K, N)
    soft = jax.nn.softmax(logits, axis=1)
    numer = jnp.sum(residual * soft[..., None], axis=2)                   # (B, K, C)
    denom = jnp.sum(soft, axis=2)[..., None]
    nodes = numer / (denom + 1e-7)
    nodes = nodes / jnp.maximum(
        jnp.sqrt(jnp.sum(nodes ** 2, axis=2, keepdims=True)), 1e-12)
    nf = nodes.reshape(B, -1)
    nf = nf / jnp.maximum(jnp.sqrt(jnp.sum(nf ** 2, axis=1, keepdims=True)), 1e-12)
    g = nf.reshape(B, C, K)
    for l in range(gcn_weights.shape[0]):
        gt = jnp.transpose(g, (0, 2, 1))
        adj = jax.nn.softmax(jnp.matmul(gt, g, precision=hp), axis=2)
        support = jnp.matmul(gt, gcn_weights[l], precision=hp)
        g = jnp.transpose(jnp.matmul(adj, support, precision=hp), (0, 2, 1))
    g = jnp.maximum(g, 0.0)
    out = jnp.matmul(g, soft, precision=hp)                               # (B, C, N)
    return out.reshape(B, C, H, W)


# TODO(synk): GCU.attention (topk + gather) is defined but never called in
# GCU.forward, so it is intentionally not implemented here.

if __name__ == "__main__":
    # Small shapes consistent with the module: GCU(node_num=8, dim=C, loop=1)
    B, C, H, W = 2, 4, 16, 16
    K = 8          # node_num
    LOOP = 1       # cascade depth

    key = jax.random.PRNGKey(0)
    k_x, k_anchor, k_sigma, k_w = jax.random.split(key, 4)

    x = jax.random.normal(k_x, (B, C, H, W), dtype=jnp.float32)
    # GraphNet params: torch.rand -> uniform [0, 1)
    anchor = jax.random.uniform(k_anchor, (K, C), dtype=jnp.float32)
    sigma_param = jax.random.uniform(k_sigma, (K, C), dtype=jnp.float32)
    # GraphConvNet weights: uniform(-stdv, stdv), stdv = 1/sqrt(out_features)
    stdv = 1.0 / math.sqrt(C)
    gcn_weights = jax.random.uniform(
        k_w, (LOOP, C, C), minval=-stdv, maxval=stdv, dtype=jnp.float32)

    # tn=128 -> two N tiles, so the init/accumulate/finalize path is exercised.
    out = gcu_forward(x, anchor, sigma_param, gcn_weights, tn=128)
    out = jax.block_until_ready(out)

    ref = gcu_reference(x, anchor, sigma_param, gcn_weights)
    # Slightly looser tolerance: the MXU reformulation (x^2 / cross-term /
    # constant expansion) rounds differently than the direct (x - a)^2 form.
    np.testing.assert_allclose(np.asarray(out), np.asarray(ref),
                               rtol=2e-3, atol=2e-4)
    assert out.shape == (B, C, H, W)
    print("KERNEL_OK")
</pallas_src>

<mosaic_0001>
module attributes {stable_mosaic.version = 11 : i64} {
  func.func @_project_kernel(%arg0: i32, %arg1: i32, %arg2: memref<1x4x128xf32, #tpu.memory_space<vmem>>, %arg3: memref<8x4xf32, #tpu.memory_space<vmem>>, %arg4: memref<8x4xf32, #tpu.memory_space<vmem>>, %arg5: memref<1x8x4xf32, #tpu.memory_space<vmem>>, %arg6: memref<1x8x128xf32, #tpu.memory_space<vmem>>, %arg7: memref<8x4xf32, #tpu.memory_space<vmem>>, %arg8: memref<8x1xf32, #tpu.memory_space<vmem>>) attributes {dimension_semantics = [#tpu.dimension_semantics<parallel>, #tpu.dimension_semantics<arbitrary>], iteration_bounds = array<i64: 2, 2>, scalar_prefetch = 0 : i64, scratch_operands = 2 : i64, tpu.core_type = #tpu.core_type<tc>, window_params = [{transform_indices = @transform_0, window_bounds = array<i64: 1, 4, 128>}, {pipeline_mode = #tpu.pipeline_mode<synchronous>, transform_indices = @transform_1, window_bounds = array<i64: 8, 4>}, {pipeline_mode = #tpu.pipeline_mode<synchronous>, transform_indices = @transform_2, window_bounds = array<i64: 8, 4>}, {transform_indices = @transform_3, window_bounds = array<i64: 1, 8, 4>}, {transform_indices = @transform_4, window_bounds = array<i64: 1, 8, 128>}]} {
    %c0_i32 = arith.constant 0 : i32
    %0 = arith.cmpi eq, %arg1, %c0_i32 : i32
    %1 = arith.extui %0 : i1 to i32
    %c0_i32_0 = arith.constant 0 : i32
    %2 = arith.cmpi ne, %1, %c0_i32_0 : i32
    scf.if %2 {
      %cst_27 = arith.constant 0.000000e+00 : f32
      %46 = vector.broadcast %cst_27 : f32 to vector<8x4xf32>
      %c0_28 = arith.constant 0 : index
      %c0_29 = arith.constant 0 : index
      %47 = vector.load %arg7[%c0_28, %c0_29] : memref<8x4xf32, #tpu.memory_space<vmem>>, vector<8x4xf32>
      tpu.vector_store %arg7[%c0_28, %c0_29], %46 {strides = array<i32>} : memref<8x4xf32, #tpu.memory_space<vmem>>, vector<8x4xf32>,
      %cst_30 = arith.constant 0.000000e+00 : f32
      %48 = vector.broadcast %cst_30 : f32 to vector<8x1xf32>
      %c0_31 = arith.constant 0 : index
      %c0_32 = arith.constant 0 : index
      %49 = vector.load %arg8[%c0_31, %c0_32] : memref<8x1xf32, #tpu.memory_space<vmem>>, vector<8x1xf32>
      tpu.vector_store %arg8[%c0_31, %c0_32], %48 {strides = array<i32>} : memref<8x1xf32, #tpu.memory_space<vmem>>, vector<8x1xf32>,
    } else {
    }
    %c0 = arith.constant 0 : index
    %c0_1 = arith.constant 0 : index
    %c0_2 = arith.constant 0 : index
    %3 = vector.load %arg2[%c0, %c0_1, %c0_2] : memref<1x4x128xf32, #tpu.memory_space<vmem>>, vector<1x4x128xf32>
    %4 = vector.shape_cast %3 : vector<1x4x128xf32> to vector<4x128xf32>
    %c0_3 = arith.constant 0 : index
    %c0_4 = arith.constant 0 : index
    %5 = vector.load %arg3[%c0_3, %c0_4] : memref<8x4xf32, #tpu.memory_space<vmem>>, vector<8x4xf32>
    %c0_5 = arith.constant 0 : index
    %c0_6 = arith.constant 0 : index
    %6 = vector.load %arg4[%c0_5, %c0_6] : memref<8x4xf32, #tpu.memory_space<vmem>>, vector<8x4xf32>
    %7 = arith.mulf %6, %6 : vector<8x4xf32>
    %8 = arith.mulf %5, %7 : vector<8x4xf32>
    %9 = arith.mulf %5, %8 : vector<8x4xf32>
    %cst = arith.constant dense<0.000000e+00> : vector<8xf32>
    %10 = vector.multi_reduction <add>, %9, %cst [1] : vector<8x4xf32> to vector<8xf32>
    %11 = vector.shape_cast %10 : vector<8xf32> to vector<8x1xf32>
    %12 = arith.mulf %4, %4 : vector<4x128xf32>
    %cst_7 = arith.constant dense<0.000000e+00> : vector<8x128xf32>
    %13 = tpu.matmul %7, %12, %cst_7 {dimension_numbers = #tpu.dot_dimension_numbers<[1], [0], [0], [1], [0, 0, 1, 1], [], []>} : vector<8x4xf32>, vector<4x128xf32>, vector<8x128xf32> -> vector<8x128xf32>
    %cst_8 = arith.constant dense<0.000000e+00> : vector<8x128xf32>
    %14 = tpu.matmul %8, %4, %cst_8 {dimension_numbers = #tpu.dot_dimension_numbers<[1], [0], [0], [1], [0, 0, 1, 1], [], []>} : vector<8x4xf32>, vector<4x128xf32>, vector<8x128xf32> -> vector<8x128xf32>
    %cst_9 = arith.constant 2.000000e+00 : f32
    %15 = vector.broadcast %cst_9 : f32 to vector<8x128xf32>
    %16 = arith.mulf %15, %14 : vector<8x128xf32>
    %17 = arith.subf %13, %16 : vector<8x128xf32>
    %18 = vector.broadcast %11 : vector<8x1xf32> to vector<8x128xf32>
    %19 = arith.addf %17, %18 : vector<8x128xf32>
    %cst_10 = arith.constant -5.000000e-01 : f32
    %20 = vector.broadcast %cst_10 : f32 to vector<8x128xf32>
    %21 = arith.mulf %20, %19 : vector<8x128xf32>
    %cst_11 = arith.constant dense<0xFF800000> : vector<128xf32>
    %22 = vector.multi_reduction <maximumf>, %21, %cst_11 [0] : vector<8x128xf32> to vector<128xf32>
    %23 = vector.shape_cast %22 : vector<128xf32> to vector<1x128xf32>
    %24 = vector.broadcast %23 : vector<1x128xf32> to vector<8x128xf32>
    %25 = arith.subf %21, %24 : vector<8x128xf32>
    %26 = math.exp %25 : vector<8x128xf32>
    %cst_12 = arith.constant dense<0.000000e+00> : vector<128xf32>
    %27 = vector.multi_reduction <add>, %26, %cst_12 [0] : vector<8x128xf32> to vector<128xf32>
    %28 = vector.shape_cast %27 : vector<128xf32> to vector<1x128xf32>
    %29 = vector.broadcast %28 : vector<1x128xf32> to vector<8x128xf32>
    %30 = arith.divf %26, %29 : vector<8x128xf32>
    %c0_13 = arith.constant 0 : index
    %c0_14 = arith.constant 0 : index
    %c0_15 = arith.constant 0 : index
    %31 = vector.load %arg6[%c0_13, %c0_14, %c0_15] : memref<1x8x128xf32, #tpu.memory_space<vmem>>, vector<1x8x128xf32>
    %32 = vector.shape_cast %31 : vector<1x8x128xf32> to vector<8x128xf32>
    %33 = vector.shape_cast %30 : vector<8x128xf32> to vector<1x8x128xf32>
    tpu.vector_store %arg6[%c0_13, %c0_14, %c0_15], %33 {strides = array<i32>} : memref<1x8x128xf32, #tpu.memory_space<vmem>>, vector<1x8x128xf32>,
    %c0_16 = arith.constant 0 : index
    %c0_17 = arith.constant 0 : index
    %34 = vector.load %arg7[%c0_16, %c0_17] : memref<8x4xf32, #tpu.memory_space<vmem>>, vector<8x4xf32>
    %cst_18 = arith.constant dense<0.000000e+00> : vector<8x4xf32>
    %35 = tpu.matmul %30, %4, %cst_18 {dimension_numbers = #tpu.dot_dimension_numbers<[1], [1], [0], [0], [0, 0, 1, 0], [], []>} : vector<8x128xf32>, vector<4x128xf32>, vector<8x4xf32> -> vector<8x4xf32>
    %36 = arith.addf %34, %35 : vector<8x4xf32>
    %c0_19 = arith.constant 0 : index
    %c0_20 = arith.constant 0 : index
    %37 = vector.load %arg7[%c0_19, %c0_20] : memref<8x4xf32, #tpu.memory_space<vmem>>, vector<8x4xf32>
    tpu.vector_store %arg7[%c0_19, %c0_20], %36 {strides = array<i32>} : memref<8x4xf32, #tpu.memory_space<vmem>>, vector<8x4xf32>,
    %c0_21 = arith.constant 0 : index
    %c0_22 = arith.constant 0 : index
    %38 = vector.load %arg8[%c0_21, %c0_22] : memref<8x1xf32, #tpu.memory_space<vmem>>, vector<8x1xf32>
    %cst_23 = arith.constant dense<0.000000e+00> : vector<8xf32>
    %39 = vector.multi_reduction <add>, %30, %cst_23 [1] : vector<8x128xf32> to vector<8xf32>
    %40 = vector.shape_cast %39 : vector<8xf32> to vector<8x1xf32>
    %41 = arith.addf %38, %40 : vector<8x1xf32>
    %c0_24 = arith.constant 0 : index
    %c0_25 = arith.constant 0 : index
    %42 = vector.load %arg8[%c0_24, %c0_25] : memref<8x1xf32, #tpu.memory_space<vmem>>, vector<8x1xf32>
    tpu.vector_store %arg8[%c0_24, %c0_25], %41 {strides = array<i32>} : memref<8x1xf32, #tpu.memory_space<vmem>>, vector<8x1xf32>,
    %c1_i32 = arith.constant 1 : i32
    %43 = arith.cmpi eq, %arg1, %c1_i32 : i32
    %44 = arith.extui %43 : i1 to i32
    %c0_i32_26 = arith.constant 0 : i32
    %45 = arith.cmpi ne, %44, %c0_i32_26 : i32
    scf.if %45 {
      %c0_27 = arith.constant 0 : index
      %c0_28 = arith.constant 0 : index
      %46 = vector.load %arg8[%c0_27, %c0_28] : memref<8x1xf32, #tpu.memory_space<vmem>>, vector<8x1xf32>
      %c0_29 = arith.constant 0 : index
      %c0_30 = arith.constant 0 : index
      %47 = vector.load %arg7[%c0_29, %c0_30] : memref<8x4xf32, #tpu.memory_space<vmem>>, vector<8x4xf32>
      %48 = vector.broadcast %46 : vector<8x1xf32> to vector<8x4xf32>
      %49 = arith.mulf %5, %48 : vector<8x4xf32>
      %50 = arith.subf %47, %49 : vector<8x4xf32>
      %51 = arith.mulf %6, %50 : vector<8x4xf32>
      %cst_31 = arith.constant 1.000000e-07 : f32
      %52 = vector.broadcast %cst_31 : f32 to vector<8x1xf32>
      %53 = arith.addf %46, %52 : vector<8x1xf32>
      %54 = vector.broadcast %53 : vector<8x1xf32> to vector<8x4xf32>
      %55 = arith.divf %51, %54 : vector<8x4xf32>
      %56 = arith.mulf %55, %55 : vector<8x4xf32>
      %cst_32 = arith.constant dense<0.000000e+00> : vector<8xf32>
      %57 = vector.multi_reduction <add>, %56, %cst_32 [1] : vector<8x4xf32> to vector<8xf32>
      %58 = vector.shape_cast %57 : vector<8xf32> to vector<8x1xf32>
      %59 = math.sqrt %58 : vector<8x1xf32>
      %cst_33 = arith.constant 9.99999996E-13 : f32
      %60 = vector.broadcast %cst_33 : f32 to vector<8x1xf32>
      %61 = arith.maximumf %59, %60 : vector<8x1xf32>
      %62 = vector.broadcast %61 : vector<8x1xf32> to vector<8x4xf32>
      %63 = arith.divf %55, %62 : vector<8x4xf32>
      %64 = arith.mulf %63, %63 : vector<8x4xf32>
      %65 = vector.shape_cast %64 : vector<8x4xf32> to vector<1x8x4xf32>
      %cst_34 = arith.constant dense<0.000000e+00> : vector<1xf32>
      %66 = vector.multi_reduction <add>, %65, %cst_34 [1, 2] : vector<1x8x4xf32> to vector<1xf32>
      %67 = vector.shape_cast %66 : vector<1xf32> to vector<1x1x1xf32>
      %68 = vector.extract %67[0, 0, 0] : f32 from vector<1x1x1xf32>
      %69 = math.sqrt %68 : f32
      %cst_35 = arith.constant 9.99999996E-13 : f32
      %70 = arith.maximumf %69, %cst_35 : f32
      %71 = vector.broadcast %70 : f32 to vector<8x4xf32>
      %72 = arith.divf %63, %71 : vector<8x4xf32>
      %c0_36 = arith.constant 0 : index
      %c0_37 = arith.constant 0 : index
      %c0_38 = arith.constant 0 : index
      %73 = vector.load %arg5[%c0_36, %c0_37, %c0_38] : memref<1x8x4xf32, #tpu.memory_space<vmem>>, vector<1x8x4xf32>
      %74 = vector.shape_cast %73 : vector<1x8x4xf32> to vector<8x4xf32>
      %75 = vector.shape_cast %72 : vector<8x4xf32> to vector<1x8x4xf32>
      tpu.vector_store %arg5[%c0_36, %c0_37, %c0_38], %75 {strides = array<i32>} : memref<1x8x4xf32, #tpu.memory_space<vmem>>, vector<1x8x4xf32>,
    } else {
    }
    return
  }
  func.func @transform_0(%arg0: i32, %arg1: i32) -> (i32, i32, i32) {
    %c0_i32 = arith.constant 0 : i32
    %c0_i32_0 = arith.constant 0 : i32
    return %arg0, %c0_i32, %arg1 : i32, i32, i32
  }
  func.func @transform_1(%arg0: i32, %arg1: i32) -> (i32, i32) {
    %c0_i32 = arith.constant 0 : i32
    %c0_i32_0 = arith.constant 0 : i32
    %c0_i32_1 = arith.constant 0 : i32
    return %c0_i32, %c0_i32_0 : i32, i32
  }
  func.func @transform_2(%arg0: i32, %arg1: i32) -> (i32, i32) {
    %c0_i32 = arith.constant 0 : i32
    %c0_i32_0 = arith.constant 0 : i32
    %c0_i32_1 = arith.constant 0 : i32
    return %c0_i32, %c0_i32_0 : i32, i32
  }
  func.func @transform_3(%arg0: i32, %arg1: i32) -> (i32, i32, i32) {
    %c0_i32 = arith.constant 0 : i32
    %c0_i32_0 = arith.constant 0 : i32
    %c0_i32_1 = arith.constant 0 : i32
    return %arg0, %c0_i32, %c0_i32_0 : i32, i32, i32
  }
  func.func @transform_4(%arg0: i32, %arg1: i32) -> (i32, i32, i32) {
    %c0_i32 = arith.constant 0 : i32
    %c0_i32_0 = arith.constant 0 : i32
    return %arg0, %c0_i32, %arg1 : i32, i32, i32
  }
}

</mosaic_0001>

<bundles_post_ra>
// kernel: tpu_custom_call.1
= control target key start
LH: loop header
LB: loop body
LE: loop exit
PB: predicated region body
PF: predicated region fallthrough
CT: control target
= control target key end

     0   :  { %10 = vsyncpa [#allocation5], 0  ;;  %s1126_s0 = inlined_call_operand.vmem [shape: f32[2,4,256], index: 0, kind: input, shape index: {}]   ;;  %s1127_s1 = inlined_call_operand.vmem [shape: f32[8,4], index: 1, kind: input, shape index: {}]   ;;  %s1128_s2 = inlined_call_operand.vmem [shape: f32[8,4], index: 2, kind: input, shape index: {}]   ;;  %s1129_s3 = inlined_call_operand.vmem [shape: f32[2,8,4], index: 3, kind: output, shape index: {0}]   ;;  %s1130_s4 = inlined_call_operand.hbm [shape: f32[2,8,256], index: 4, kind: output, shape index: {1}]  }
   0x1   :  { %12 = vsyncpa [#allocation5 + $0x1], 0  ;;  %s954_s15 = smov 0   ;;  %s956_s16 = smov 0  }
   0x2   :  { %s958_s17 = smov 0   ;;  %s960_s18 = smov 0  }
   0x3   :  { %s962_s19 = smov 0   ;;  %s964_s20 = smov 0  }
   0x4   :  { %s966_s21 = smov 0   ;;  %s968_s22 = smov 0  }
   0x5 LB: > { %s691_s23 = sadd.s32 4294967295, %s921_s22   ;;  %s692_s24 = sadd.s32 4294967294, %s921_s22   ;;  %s921_s22 = sphi %s968_s22, %s18_s22   ;;  %s917_s21 = sphi %s966_s21, %s1145_s21   ;;  %s913_s20 = sphi %s964_s20, %s1144_s20   ;;  %s909_s19 = sphi %s962_s19, %s1143_s19   ;;  %s905_s18 = sphi %s960_s18, %s1142_s18   ;;  %s901_s17 = sphi %s958_s17, %s1141_s17   ;;  %s897_s16 = sphi %s956_s16, %s1140_s16   ;;  %s893_s15 = sphi %s954_s15, %s1139_s15  }
   0x6   : > { %s27_s25 = sadd.s32 1, %s913_s20  ;;  %s30_s26 = sadd.s32 1, %s917_s21 }
   0x7   : > { %p28_p0 = scmp.ge.s32.totalorder %s27_s25, 2  ;;  %p145_p1 = scmp.ne.s32.totalorder %s901_s17, %s897_s16 }
   0x8   : > { %p146_p2 = scmp.eq.s32.totalorder %s691_s23, 3  ;;  %p151_p5 = scmp.ne.s32.totalorder %s897_s16, %s893_s15 }
   0x9   : > { %s1147_s25 = smov (%p28_p0, %s27_s25), 0  ;;  %s1149_s26 = smov (!%p28_p0, %s30_s26), %s917_s21 }
   0xa   : > { %1133 = sst [smem:[#allocation7_spill]] %s1147_s25  ;;  %s131_s27 = ssub.s32 %s913_s20, %s1147_s25 }
   0xb   : > { %p1005_p3 = por %p146_p2, %p145_p1  ;;  %p32_p4 = scmp.ge.s32.totalorder %s1149_s26, 2 }
   0xc   : > { %p152_p6 = scmp.eq.s32.totalorder %s692_s24, 3  ;;  %p695_p7 = scmp.ge.s32.totalorder %s921_s22, 1 }
   0xd   : > { %s1151_s26 = smov (%p32_p4, %s1149_s26), 0  ;;  %p187_p9 = scmp.lt.s32.totalorder %s921_s22, 5 }
   0xe   : > { %1135 = sst [smem:[#allocation8_spill]] %s1151_s26  ;;  %p1014_p8 = por %p152_p6, %p151_p5 }
   0xf   : > { %s130_s30 = ssub.s32 %s917_s21, %s1151_s26  ;;  %s135_s5 = sadd.s32 1, %s901_s17 }
  0x10   : > { %s132_s6 = sor.u32 %s131_s27, %s130_s30  ;;  %p188_p10 = pnand %p695_p7, %p187_p9 }
  0x11   : > { %p133_p11 = scmp.eq.s32.totalorder %s132_s6, 0  ;;  %s217_s8 = sand.u32 (!%p188_p10), 1, %s897_s16  }
  0x12   : > { %191 = sbr.rel (%p188_p10) target bundleno = 1100 (0x44c), region = 32  ;;  %p220_p12 = scmp.lt.s32.totalorder (!%p188_p10), %s909_s19, 1 }
  0x13   : > { %s1023_s7 = scalar_select %p133_p11, %s901_s17, %s135_s5  }
  0x14   : > { %s1029_s9 = sshll.u32 (!%p188_p10), %s217_s8, 3  ;;  %p222_p13 = scmp.lt.s32.totalorder (!%p188_p10), %s905_s18, 1 }
  0x15   : > { %s219_s25 = scalar_lea.vmem (!%p188_p10), [#allocation4], %s1029_s9  ;;  %p700_p0 = scmp.ne.s32.totalorder (!%p188_p10), %s905_s18, 0 }
  0x19   : > { %s221_s10 = scalar_select %p220_p12, %s909_s19, 1 }
  0x1a   : > { %s223_s11 = scalar_select %p222_p13, %s905_s18, 1 }
  0x1b   : > { %s697_s12 = sshll.u32 %s221_s10, 1  ;;  %s699_s13 = sshll.u32 %s221_s10, 3  ;;  %vm236_vm0 = vcmask (!%p700_p0), 31744   ;;  %vm238_vm1 = vcmask (!%p700_p0), 7168   ;;  %v923_v0 = vmov (!%p700_p0), 0.0  }
  0x1c   : > { %s225_s14 = sadd.s32 %s697_s12, %s223_s11  ;;  %s1037_s27 = scalar_lea.vmem %s1129_s3, %s699_s13  ;;  %237 = vst.msk [vmem:[#allocation2] sm:$0xff] (!%p700_p0), %vm236_vm0, %v923_v0 }
  0x1d   : > { %s698_s30 = sshll.u32 %s225_s14, 2  ;;  %235 = sbr.rel (%p700_p0) target bundleno = 36 (0x24), region = 36  ;;  %239 = vst.msk [vmem:[#allocation3] sm:$0xff] (!%p700_p0), %vm238_vm1, %v923_v0 }
  0x1e   : > { %s227_s26 = scalar_lea.vmem %s1126_s0, %s698_s30 }
  0x24 PF: > { %v240_v1 = vld [vmem:[%s227_s26] sm:$0xf]  ;;  %vm254_vm2 = vcmask 1043456   ;;  %v924_v2 = vmov 0.0   ;;  %vm246_vm3 = vcmask 31744   ;;  %vm925_vm4 = vmmov 0  }
  0x25   : > { %722 = vmatprep.subr.mxu1 %v924_v2  ;;  %717 = vmatprep.subr.mxu0 %v924_v2  ;;  %v250_v3 = vmul.f32 %v240_v1, %v240_v1  ;;  %v1047_v4 = vld [vmem:[%s1127_s1] sm:$0xff]  ;;  %v499_v36 = vld [vmem:[#allocation3] sm:$0xff]  ;;  %vm503_vm5 = vcmask 7168   ;;  %p705_p1 = scmp.ne.s32.totalorder %s905_s18, 1 }
  0x26   : > { %v1052_v5 = vld [vmem:[%s1128_s2] sm:$0xff]  ;;  %723 = vmatpush3.msk.msra.mxu1 %vm254_vm2, %v240_v1  ;;  %724 = vmatprep.mubr.msk.f32.mxu1 %vm925_vm4, %v924_v2  ;;  %v926_v44 = vmov (!%p705_p1), 0   ;;  %s927_s23 = smov (!%p705_p1), 1e-12  }
  0x27   : > { %v243_v6 = vmul.f32 %v1052_v5, %v1052_v5  ;;  %718 = vmatpush3.msk.msra.mxu0 %vm254_vm2, %v250_v3  ;;  %719 = vmatprep.mubr.msk.f32.mxu0 %vm925_vm4, %v924_v2  ;;  %v426_v39 = vld [vmem:[#allocation2] sm:$0xff] }
  0x28   : > { %727 = vmatprep.subr.mxu0 %v924_v2  ;;  %816 = vset.pattern.permute.xlu0 (!%p705_p1), %v926_v44 }
  0x29   : > { %v244_v7 = vmul.f32 %v243_v6, %v1047_v4  ;;  %720 = vmatmul.mubr.msk.f32.vlgmr.msra.gmra.mrb[0].mxu0 %vm246_vm3, %v243_v6 }
  0x2a   : > { %729 = vmatprep.mubr.msk.f32.mxu0 %vm925_vm4, %v924_v2 }
  0x2b   : > { %725 = vmatmul.mubr.msk.f32.vlgmr.msra.gmra.mrb[0].mxu1 %vm246_vm3, %v244_v7  ;;  %v245_v8 = vmul.f32 %v244_v7, %v1047_v4 }
  0x2d   : > { %v247_v9 = vsel %vm246_vm3, %v245_v8, 0.0 }
  0x2e   : > { %248 = vadd.xlane.f32.xlu0 %v247_v9  ;;  %728 = vmatpush3.xpose.msra.mxu0 %v240_v1 }
  0xbb   : > { %v249_v15 = vpop.xlane.xlu0 %248 }
  0xfc   : > { %v324_v10 = vpop.f32.mrb[0].mxu0 }
  0xfd   : > { %v721_v11 = vpop.f32.mrb[1].mxu0 }
  0xfe   : > { %v400_v12 = vpop.f32.mrb[0].mxu1 }
  0xff   : > { %v404_v13 = vmul.f32 2.0, %v400_v12  ;;  %v726_v14 = vpop.f32.mrb[1].mxu1 }
 0x101   : > { %v405_v16 = vsub.f32 %v324_v10, %v404_v13 }
 0x103   : > { %v406_v17 = vadd.f32 %v405_v16, %v249_v15 }
 0x105   : > { %v407_v18 = vmul.f32 -0.5, %v406_v17 }
 0x107   : > { %v408_v19 = vrot.slane %v407_v18, 4 }
 0x109   : > { %v409_v20 = vmax.f32 %v407_v18, %v408_v19 }
 0x10b   : > { %v410_v21 = vrot.slane %v409_v20, 2 }
 0x10d   : > { %v411_v22 = vmax.f32 %v409_v20, %v410_v21 }
 0x10f   : > { %v412_v23 = vrot.slane %v411_v22, 1 }
 0x111   : > { %v413_v24 = vmax.f32 %v411_v22, %v412_v23 }
 0x113   : > { %v414_v25 = vsub.f32 %v407_v18, %v413_v24 }
 0x115   : > { %v415_v26 = vmul.f32 1.442695, %v414_v25 }
 0x117   : > { %812 = vpow2.f32 %v415_v26 }
 0x121   : > { %v813_v27 = vpop.eup %812 }
 0x122   : > { %v417_v28 = vrot.slane %v813_v27, 4 }
 0x124   : > { %v418_v29 = vadd.f32 %v813_v27, %v417_v28 }
 0x126   : > { %v419_v30 = vrot.slane %v418_v29, 2 }
 0x128   : > { %v420_v31 = vadd.f32 %v419_v30, %v418_v29 }
 0x12a   : > { %v421_v32 = vrot.slane %v420_v31, 1 }
 0x12c   : > { %v422_v33 = vadd.f32 %v421_v32, %v420_v31 }
 0x12e   : > { %814 = vrcp.f32 %v422_v33 }
 0x138   : > { %v815_v34 = vpop.eup %814 }
 0x139   : > { %v424_v35 = vmul.f32 %v815_v34, %v813_v27 }
 0x13b   : > { %500 = vadd.xlane.f32.xlu0 %v424_v35  ;;  %425 = vst [vmem:[%s219_s25] sm:$0xff] %v424_v35  ;;  %730 = vmatmul.mubr.f32.vlgmr.msra.gmra.mrb[2].mxu0 %v424_v35 }
 0x1c8   : > { %v501_v37 = vpop.xlane.xlu0 %500 }
 0x1c9   : > { %v502_v38 = vadd.f32 %v501_v37, %v499_v36 }
 0x1cb   : > { %504 = vst.msk [vmem:[#allocation3] sm:$0xff] %vm503_vm5, %v502_v38 }
 0x1d2   : > { %v509_v43 = vld [vmem:[#allocation3] sm:$0xff] (!%p705_p1) }
 0x1d3   : > { %v519_v45 = vadd.f32 (!%p705_p1), 1e-07, %v509_v43 }
 0x1d5   : > { %522 = vperm.xlu0 (!%p705_p1), %816, %v519_v45  }
 0x1d9   : > { %513 = vperm.xlu0 (!%p705_p1), %816, %v509_v43  }
 0x20b   : > { %508 = sbr.rel (%p705_p1) target bundleno = 1074 (0x432), region = 40 }
 0x20e   : > { %v493_v40 = vpop.f32.mrb[2].mxu0 }
 0x20f   : > { %v497_v41 = vadd.f32 %v493_v40, %v426_v39  ;;  %v731_v42 = vpop.f32.mrb[3].mxu0 }
 0x211   : > { %498 = vst.msk [vmem:[#allocation2] sm:$0xff] %vm246_vm3, %v497_v41 }
 0x218   : > { %v510_v47 = vld [vmem:[#allocation2] sm:$0xff] }
 0x254   : > { %v523_v46 = vpop.permute.xlu0 %522 }
 0x255   : > { %817 = vrcp.f32 %v523_v46 }
 0x258   : > { %v514_v48 = vpop.permute.xlu0 %513 }
 0x259   : > { %v516_v49 = vmul.f32 %v514_v48, %v1047_v4 }
 0x25b   : > { %v517_v50 = vsub.f32 %v510_v47, %v516_v49 }
 0x25d   : > { %v518_v51 = vmul.f32 %v517_v50, %v1052_v5 }
 0x25f   : > { %v818_v52 = vpop.eup %817 }
 0x260   : > { %v526_v53 = vmul.f32 %v818_v52, %v518_v51 }
 0x262   : > { %v527_v54 = vmul.f32 %v526_v53, %v526_v53 }
 0x264   : > { %v528_v55 = vsel %vm246_vm3, %v527_v54, 0.0 }
 0x265   : > { %529 = vadd.xlane.f32.xlu1 %v528_v55 }
 0x2f2   : > { %v530_v56 = vpop.xlane.xlu1 %529 }
 0x2f3   : > { %819 = vrsqrt.f32 %v530_v56  ;;  %vm533_vm6 = vcmp.eq.f32.partialorder %v530_v56, inf  ;;  %v536_v59 = vand.u32 2147483648, %v530_v56  ;;  %vm535_vm7 = vcmp.eq.f32.partialorder %v530_v56, 0.0 }
 0x2fd   : > { %v820_v57 = vpop.eup %819 }
 0x2fe   : > { %v532_v58 = vmul.f32 %v820_v57, %v530_v56 }
 0x300   : > { %v534_v60 = vsel %vm533_vm6, %v530_v56, %v532_v58 }
 0x301   : > { %v537_v61 = vsel %vm535_vm7, %v536_v59, %v534_v60 }
 0x302   : > { %v538_v62 = vmax.f32 %v537_v61, 1e-12 }
 0x304   : > { %821 = vrcp.f32 %v538_v62 }
 0x30e   : > { %v822_v63 = vpop.eup %821 }
 0x30f   : > { %v540_v0 = vmul.f32 %v822_v63, %v526_v53 }
 0x311   : > { %v541_v1 = vmul.f32 %v540_v0, %v540_v0 }
 0x313   : > { %v542_v2 = vsel %vm246_vm3, %v541_v1, 0.0 }
 0x314   : > { %543 = vadd.xlane.f32.xlu1 %v542_v2 }
 0x3a1   : > { %v544_v3 = vpop.xlane.xlu1 %543 }
 0x3a2   : > { %v545_v4 = vrot.slane %v544_v3, 4 }
 0x3a4   : > { %v546_v5 = vadd.f32 %v545_v4, %v544_v3 }
 0x3a6   : > { %v547_v6 = vrot.slane %v546_v5, 2 }
 0x3a8   : > { %v548_v7 = vadd.f32 %v547_v6, %v546_v5 }
 0x3aa   : > { %v549_v8 = vrot.slane %v548_v7, 1 }
 0x3ac   : > { %v550_v9 = vadd.f32 %v549_v8, %v548_v7 }
 0x3ae   : > { %732 = vpush %v550_v9 }
 0x3df   : > { %s733_s26 = spop %732 }
 0x3e0   : > { %v552_v10 = vstv %s733_s26 }
 0x3e1   : > { %823 = vrsqrt.f32 %v552_v10  ;;  %vm555_vm8 = vcmp.eq.f32.partialorder %v552_v10, inf  ;;  %v558_v13 = vand.u32 2147483648, %v552_v10  ;;  %vm557_vm9 = vcmp.eq.f32.partialorder %v552_v10, 0.0 }
 0x3eb   : > { %v824_v11 = vpop.eup %823 }
 0x3ec   : > { %v554_v12 = vmul.f32 %v824_v11, %v552_v10 }
 0x3ee   : > { %v556_v14 = vsel %vm555_vm8, %v552_v10, %v554_v12 }
 0x3ef   : > { %v559_v15 = vsel %vm557_vm9, %v558_v13, %v556_v14 }
 0x3f0   : > { %734 = vpush %v559_v15 }
 0x421   : > { %s735_s14 = spop %734 }
 0x422   : > { %s561_s24 = smax.f32 %s927_s23, %s735_s14 }
 0x423   : > { %v562_v16 = vstv %s561_s24 }
 0x424   : > { %825 = vrcp.f32 %v562_v16 }
 0x42e   : > { %v826_v17 = vpop.eup %825 }
 0x42f   : > { %v564_v18 = vmul.f32 %v826_v17, %v540_v0 }
 0x431   : > { %565 = vst.msk [vmem:[%s1037_s27] sm:$0xff] %vm246_vm3, %v564_v18 }
 0x432 PF: > { %s707_s30 = sshll.u32 %s909_s19, 1  ;;  %s589_s6 = sshll.u32 %s219_s25, 4  ;;  %s1075_s6 = int_to_ptr.vmem [resolvable:$true] %s589_s6 }
 0x433   : > { %s585_s5 = sadd.s32 %s905_s18, %s707_s30  ;;  %s571_s13 = scalar_lea.sflag [#allocation5], %s217_s8 }
 0x434   : > { %s708_s10 = sshll.u32 %s585_s5, 7  ;;  %s827_s26 = scalar_lea.vmem %s1075_s6, 128 }
 0x435   : > { %s587_s27 = scalar_lea.hbm %s1130_s4, %s708_s10  ;;  %p828_p2 = scmp.ne.s32.totalorder %s1075_s6, %s827_s26 }
 0x436   : > { %s928_s18 = smov [#allocation4]  }
 0x437   : > { %p829_p4 = pnand %p828_p2, %p1005_p3  ;;  %s831_s19 = sshll.u32 %s928_s18, 4  ;;  %s832_s19 = int_to_ptr.vmem [resolvable:$false] %s831_s19 }
 0x438   : > { %s833_s25 = scalar_lea.vmem %s832_s19, 256  ;;  %p834_p6 = scmp.lt.s32.totalorder %s1075_s6, %s832_s19 }
 0x439   : > { %p830_p5 = pneg %p829_p4  ;;  %p835_p7 = scmp.lt.s32.totalorder %s833_s25, %s827_s26 }
 0x43b   : > { %p836_p9 = por %p835_p7, %p834_p6 }
 0x43d   : > { %p837_p10 = pnand %p836_p9, %p830_p5 }
 0x43f   : > { %840 = shalt.err (!%p837_p10)
}
 0x440   : > { %s841_s9 = scalar_lea.hbm %s587_s27, 128  ;;  %s845_s23 = scalar_lea.hbm %s1130_s4, 512 }
 0x441   : > { %p842_p11 = scmp.ne.s32.totalorder %s587_s27, %s841_s9  ;;  %p846_p0 = scmp.lt.u32.totalorder %s587_s27, %s1130_s4 }
 0x442   : > { %p847_p1 = scmp.lt.u32.totalorder %s845_s23, %s841_s9  ;;  %p849_p4 = scmp.lt.u32.totalorder %s841_s9, %s587_s27 }
 0x443   : > { %p843_p12 = pnand %p842_p11, %p1005_p3 }
 0x444   : > { %p848_p2 = por %p847_p1, %p846_p0 }
 0x445   : > { %p844_p13 = pneg %p843_p12 }
 0x446   : > { %p850_p6 = por %p849_p4, %p848_p2 }
 0x448   : > { %p851_p5 = pnand %p850_p6, %p844_p13 }
 0x44a   : > { %854 = shalt.err (!%p851_p5)
}
 0x44b   : > { %736 = dma.vmem_to_hbm [thread:$0]  (%p1005_p3), %s1075_s6, 128, %s587_s27, %s571_s13  }
 0x44c PF: > { %p742_p7 = scmp.ge.s32.totalorder %s921_s22, 2  ;;  %s608_s5 = sand.u32 1, %s893_s15  }
 0x44d   : > { %s609_s10 = scalar_lea.sflag [#allocation5], %s608_s5 }
 0x44e   : > { %p739_p9 = pnand %p742_p7, %p1014_p8 }
 0x450   : > { %888 = dma.done.wait (!%p739_p9), %s609_s10, 128  }
 0x451   : > { %890 = vsyncadd (!%p739_p9), %s609_s10, 4294967168  ;;  %s18_s22 = sadd.s32 1, %s921_s22   ;;  %s1137_s28 = sld [smem:[#allocation7_spill]] }
 0x452   : > { %p15_p10 = scmp.ge.s32.totalorder %s18_s22, 6   ;;  %s1138_s6 = sld [smem:[#allocation8_spill]] }
 0x453   : > { %s1139_s15 = smov %s897_s16  ;;  %s1140_s16 = smov %s901_s17 }
 0x454   : > { %s1141_s17 = smov %s1023_s7  ;;  %s1142_s18 = smov %s913_s20 }
 0x455   : > { %s1143_s19 = smov %s917_s21  ;;  %17 = sbr.rel (!%p15_p10) target bundleno = 5 (0x5), region = 87 }
 0x457   : > { %s1144_s20 = smov %s1137_s28 }
 0x458   : > { %s1145_s21 = smov %s1138_s6 }
 0x45c   :  { %614 = vsyncpa [#allocation5], 1 }
 0x45d   :  { %616 = vsyncpa [#allocation5 + $0x1], 1 }

</bundles_post_ra>
